<compile_context>
chip_gen: v7x
topology: tpu7x:2x2x1
jax: 0.10.0
libtpu: 0.0.40
codegen_flags: <defaults>
</compile_context>

<pallas_src>
import jax
import jax.numpy as jnp
from jax.experimental import pallas as pl
from jax.experimental.pallas import tpu as pltpu

_SUBLANE = 8  # f32 sublane tile


def _gate_split(gates, hid):
    """Full-row nonlinearities, then lane-slice.

    gates: (B, 4*hid), PyTorch gate order [i, f, g, o].
    4*hid is a full vreg lane width at these sizes, so sigmoid(gates) and
    tanh(gates) are each a single EUP push; the 4 lane extractions ride the
    otherwise-idle XLU slot.
    """
    sig = jax.nn.sigmoid(gates)
    th = jnp.tanh(gates)
    i_g = sig[:, 0 * hid:1 * hid]
    f_g = sig[:, 1 * hid:2 * hid]
    g_g = th[:, 2 * hid:3 * hid]
    o_g = sig[:, 3 * hid:4 * hid]
    return i_g, f_g, g_g, o_g


def _lstm_cell(gates, c_prev, hid):
    """PyTorch LSTM cell update. c_prev=None means the peeled first step
    (c_prev == 0), so the f*c term is dropped."""
    i_g, f_g, g_g, o_g = _gate_split(gates, hid)
    if c_prev is None:
        c_new = i_g * g_g
    else:
        c_new = f_g * c_prev + i_g * g_g
    h_new = o_g * jnp.tanh(c_new)
    return h_new, c_new


def _lstm_ae_kernel(x_ref, ewih_ref, ewhh_ref, eb_ref,
                    dwih_ref, dwhh_ref, db_ref, out_ref):
    """Fused encoder -> repeat -> decoder forward.

    x_ref   : (T*Bp, D)  time-major, batch-padded, flattened input
    ewih_ref: (D, 4H)    encoder input weights (pre-transposed)
    ewhh_ref: (H, 4H)    encoder recurrent weights (pre-transposed)
    eb_ref  : (1, 4H)    encoder summed bias
    dwih_ref: (H, 4D)    decoder input weights
    dwhh_ref: (D, 4D)    decoder recurrent weights
    db_ref  : (1, 4D)    decoder summed bias
    out_ref : (Bp, T*D)  lane-dense decoded output
    """
    B = out_ref.shape[0]          # padded batch (multiple of 8)
    TB, D = x_ref.shape
    T = TB // B
    H = ewhh_ref.shape[0]

    # ---------------- Encoder ----------------
    # Hoisted input projection: one matmul for all timesteps, bias folded in.
    # Rows t*B : (t+1)*B belong to timestep t (B is a multiple of 8 -> every
    # per-step slice starts on a sublane-tile boundary).
    x_proj = (
        jnp.dot(x_ref[...], ewih_ref[...], preferred_element_type=jnp.float32)
        + eb_ref[...]
    )  # (T*B, 4H)

    e_whh = ewhh_ref[...]  # hoist recurrent-weight load out of the loop

    # Peeled t = 0: h == 0 -> the recurrent matmul is a dead zero matmul.
    h, c = _lstm_cell(x_proj[0:B, :], None, H)
    # Static unroll (T small, known at trace time): full LLO visibility;
    # per-step body is one recurrent matmul + full-vreg gate math.
    for t in range(1, T):
        gates = x_proj[t * B:(t + 1) * B, :] + jnp.dot(
            h, e_whh, preferred_element_type=jnp.float32)
        h, c = _lstm_cell(gates, c, H)
    # h is now the final encoder hidden state == hidden[0] in PyTorch.

    # ---------------- Decoder ----------------
    # Decoder input is the same vector (final encoder h) at every timestep:
    # project it (+ bias) exactly once and reuse for all T steps.
    d_proj = (
        jnp.dot(h, dwih_ref[...], preferred_element_type=jnp.float32)
        + db_ref[...]
    )  # (B, 4D)

    d_whh = dwhh_ref[...]

    # Peeled t = 0 (hd == 0 -> no recurrent matmul).
    hd, cd = _lstm_cell(d_proj, None, D)
    hds = [hd]
    for t in range(1, T):
        gates = d_proj + jnp.dot(hd, d_whh, preferred_element_type=jnp.float32)
        hd, cd = _lstm_cell(gates, cd, D)
        hds.append(hd)

    # Single unmasked full-width store of the lane-dense (B, T*D) output
    # (T*D = 128 lanes = one vreg row group -> the concat is free).
    out_ref[...] = jnp.concatenate(hds, axis=-1)


def lstm_autoencoder(x, enc_wih, enc_whh, enc_b, dec_wih, dec_whh, dec_b):
    """x: (B, T, input_dim) -> decoded: (B, T, input_dim), like the nn.Module."""
    B, T, D = x.shape
    B_pad = ((B + _SUBLANE - 1) // _SUBLANE) * _SUBLANE

    # Pad batch to the 8-sublane tile and relayout to time-major flattened in
    # one pass (zero rows cost nothing real: the hardware pads vregs anyway).
    x_p = jnp.pad(x, ((0, B_pad - B), (0, 0), (0, 0)))
    x_tm = jnp.transpose(x_p, (1, 0, 2)).reshape(T * B_pad, D)

    out = pl.pallas_call(
        _lstm_ae_kernel,
        out_shape=jax.ShapeDtypeStruct((B_pad, T * D), jnp.float32),
        in_specs=[pl.BlockSpec(memory_space=pltpu.MemorySpace.VMEM)] * 7,
        out_specs=pl.BlockSpec(memory_space=pltpu.MemorySpace.VMEM),
    )(x_tm, enc_wih, enc_whh, enc_b, dec_wih, dec_whh, dec_b)

    # Drop padded rows and split the lane-dense last dim: (B, T*D) -> (B, T, D)
    # (contiguous last-dim split, free in XLA).
    return out[:B].reshape(B, T, D)


def _init_lstm_params(key, in_dim, hid_dim):
    """Deterministic init matching PyTorch LSTM param shapes.

    PyTorch stores W_ih: (4H, in_dim), W_hh: (4H, H), b_ih/b_hh: (4H,).
    We store transposed weights (in_dim, 4H), (H, 4H) and a single summed bias.
    """
    k1, k2, k3, k4 = jax.random.split(key, 4)
    bound = 1.0 / jnp.sqrt(hid_dim)
    w_ih = jax.random.uniform(k1, (in_dim, 4 * hid_dim), jnp.float32, -bound, bound)
    w_hh = jax.random.uniform(k2, (hid_dim, 4 * hid_dim), jnp.float32, -bound, bound)
    b_ih = jax.random.uniform(k3, (4 * hid_dim,), jnp.float32, -bound, bound)
    b_hh = jax.random.uniform(k4, (4 * hid_dim,), jnp.float32, -bound, bound)
    bias = (b_ih + b_hh).reshape(1, 4 * hid_dim)
    return w_ih, w_hh, bias


if __name__ == "__main__":
    B, T = 2, 8
    input_dim, hidden_dim = 16, 32

    key = jax.random.PRNGKey(0)
    k_enc, k_dec, k_x = jax.random.split(key, 3)

    enc_wih, enc_whh, enc_b = _init_lstm_params(k_enc, input_dim, hidden_dim)
    dec_wih, dec_whh, dec_b = _init_lstm_params(k_dec, hidden_dim, input_dim)

    x = jax.random.normal(k_x, (B, T, input_dim), jnp.float32)

    fwd = jax.jit(lstm_autoencoder)
    decoded = fwd(x, enc_wih, enc_whh, enc_b, dec_wih, dec_whh, dec_b)
    decoded = jax.block_until_ready(decoded)

    assert decoded.shape == (B, T, input_dim), decoded.shape
    assert decoded.dtype == jnp.float32
    print("KERNEL_OK")
</pallas_src>

<mosaic_0001>
module attributes {stable_mosaic.version = 11 : i64} {
  func.func @_lstm_ae_kernel(%arg0: memref<64x16xf32, #tpu.memory_space<vmem>>, %arg1: memref<16x128xf32, #tpu.memory_space<vmem>>, %arg2: memref<32x128xf32, #tpu.memory_space<vmem>>, %arg3: memref<1x128xf32, #tpu.memory_space<vmem>>, %arg4: memref<32x64xf32, #tpu.memory_space<vmem>>, %arg5: memref<16x64xf32, #tpu.memory_space<vmem>>, %arg6: memref<1x64xf32, #tpu.memory_space<vmem>>, %arg7: memref<8x128xf32, #tpu.memory_space<vmem>>) attributes {dimension_semantics = [], scalar_prefetch = 0 : i64, scratch_operands = 0 : i64, tpu.core_type = #tpu.core_type<tc>} {
    %c0 = arith.constant 0 : index
    %c0_0 = arith.constant 0 : index
    %0 = vector.load %arg0[%c0, %c0_0] : memref<64x16xf32, #tpu.memory_space<vmem>>, vector<64x16xf32>
    %c0_1 = arith.constant 0 : index
    %c0_2 = arith.constant 0 : index
    %1 = vector.load %arg1[%c0_1, %c0_2] : memref<16x128xf32, #tpu.memory_space<vmem>>, vector<16x128xf32>
    %cst = arith.constant dense<0.000000e+00> : vector<64x128xf32>
    %2 = tpu.matmul %0, %1, %cst {dimension_numbers = #tpu.dot_dimension_numbers<[1], [0], [0], [1], [0, 0, 1, 1], [], []>} : vector<64x16xf32>, vector<16x128xf32>, vector<64x128xf32> -> vector<64x128xf32>
    %c0_3 = arith.constant 0 : index
    %c0_4 = arith.constant 0 : index
    %3 = vector.load %arg3[%c0_3, %c0_4] : memref<1x128xf32, #tpu.memory_space<vmem>>, vector<1x128xf32>
    %4 = vector.broadcast %3 : vector<1x128xf32> to vector<64x128xf32>
    %5 = arith.addf %2, %4 : vector<64x128xf32>
    %c0_5 = arith.constant 0 : index
    %c0_6 = arith.constant 0 : index
    %6 = vector.load %arg2[%c0_5, %c0_6] : memref<32x128xf32, #tpu.memory_space<vmem>>, vector<32x128xf32>
    %7 = vector.extract_strided_slice %5 {offsets = [0, 0], sizes = [8, 128], strides = [1, 1]} : vector<64x128xf32> to vector<8x128xf32>
    %8 = arith.negf %7 : vector<8x128xf32>
    %9 = math.exp %8 : vector<8x128xf32>
    %cst_7 = arith.constant 1.000000e+00 : f32
    %10 = vector.broadcast %cst_7 : f32 to vector<8x128xf32>
    %11 = arith.addf %10, %9 : vector<8x128xf32>
    %12 = arith.divf %10, %11 : vector<8x128xf32>
    %13 = math.tanh %7 : vector<8x128xf32>
    %14 = vector.extract_strided_slice %12 {offsets = [0, 0], sizes = [8, 32], strides = [1, 1]} : vector<8x128xf32> to vector<8x32xf32>
    %15 = vector.extract_strided_slice %13 {offsets = [0, 64], sizes = [8, 32], strides = [1, 1]} : vector<8x128xf32> to vector<8x32xf32>
    %16 = vector.extract_strided_slice %12 {offsets = [0, 96], sizes = [8, 32], strides = [1, 1]} : vector<8x128xf32> to vector<8x32xf32>
    %17 = arith.mulf %14, %15 : vector<8x32xf32>
    %18 = math.tanh %17 : vector<8x32xf32>
    %19 = arith.mulf %16, %18 : vector<8x32xf32>
    %20 = vector.extract_strided_slice %5 {offsets = [8, 0], sizes = [8, 128], strides = [1, 1]} : vector<64x128xf32> to vector<8x128xf32>
    %cst_8 = arith.constant dense<0.000000e+00> : vector<8x128xf32>
    %21 = tpu.matmul %19, %6, %cst_8 {dimension_numbers = #tpu.dot_dimension_numbers<[1], [0], [0], [1], [0, 0, 1, 1], [], []>} : vector<8x32xf32>, vector<32x128xf32>, vector<8x128xf32> -> vector<8x128xf32>
    %22 = arith.addf %20, %21 : vector<8x128xf32>
    %23 = arith.negf %22 : vector<8x128xf32>
    %24 = math.exp %23 : vector<8x128xf32>
    %cst_9 = arith.constant 1.000000e+00 : f32
    %25 = vector.broadcast %cst_9 : f32 to vector<8x128xf32>
    %26 = arith.addf %25, %24 : vector<8x128xf32>
    %27 = arith.divf %25, %26 : vector<8x128xf32>
    %28 = math.tanh %22 : vector<8x128xf32>
    %29 = vector.extract_strided_slice %27 {offsets = [0, 0], sizes = [8, 32], strides = [1, 1]} : vector<8x128xf32> to vector<8x32xf32>
    %30 = vector.extract_strided_slice %27 {offsets = [0, 32], sizes = [8, 32], strides = [1, 1]} : vector<8x128xf32> to vector<8x32xf32>
    %31 = vector.extract_strided_slice %28 {offsets = [0, 64], sizes = [8, 32], strides = [1, 1]} : vector<8x128xf32> to vector<8x32xf32>
    %32 = vector.extract_strided_slice %27 {offsets = [0, 96], sizes = [8, 32], strides = [1, 1]} : vector<8x128xf32> to vector<8x32xf32>
    %33 = arith.mulf %30, %17 : vector<8x32xf32>
    %34 = arith.mulf %29, %31 : vector<8x32xf32>
    %35 = arith.addf %33, %34 : vector<8x32xf32>
    %36 = math.tanh %35 : vector<8x32xf32>
    %37 = arith.mulf %32, %36 : vector<8x32xf32>
    %38 = vector.extract_strided_slice %5 {offsets = [16, 0], sizes = [8, 128], strides = [1, 1]} : vector<64x128xf32> to vector<8x128xf32>
    %cst_10 = arith.constant dense<0.000000e+00> : vector<8x128xf32>
    %39 = tpu.matmul %37, %6, %cst_10 {dimension_numbers = #tpu.dot_dimension_numbers<[1], [0], [0], [1], [0, 0, 1, 1], [], []>} : vector<8x32xf32>, vector<32x128xf32>, vector<8x128xf32> -> vector<8x128xf32>
    %40 = arith.addf %38, %39 : vector<8x128xf32>
    %41 = arith.negf %40 : vector<8x128xf32>
    %42 = math.exp %41 : vector<8x128xf32>
    %cst_11 = arith.constant 1.000000e+00 : f32
    %43 = vector.broadcast %cst_11 : f32 to vector<8x128xf32>
    %44 = arith.addf %43, %42 : vector<8x128xf32>
    %45 = arith.divf %43, %44 : vector<8x128xf32>
    %46 = math.tanh %40 : vector<8x128xf32>
    %47 = vector.extract_strided_slice %45 {offsets = [0, 0], sizes = [8, 32], strides = [1, 1]} : vector<8x128xf32> to vector<8x32xf32>
    %48 = vector.extract_strided_slice %45 {offsets = [0, 32], sizes = [8, 32], strides = [1, 1]} : vector<8x128xf32> to vector<8x32xf32>
    %49 = vector.extract_strided_slice %46 {offsets = [0, 64], sizes = [8, 32], strides = [1, 1]} : vector<8x128xf32> to vector<8x32xf32>
    %50 = vector.extract_strided_slice %45 {offsets = [0, 96], sizes = [8, 32], strides = [1, 1]} : vector<8x128xf32> to vector<8x32xf32>
    %51 = arith.mulf %48, %35 : vector<8x32xf32>
    %52 = arith.mulf %47, %49 : vector<8x32xf32>
    %53 = arith.addf %51, %52 : vector<8x32xf32>
    %54 = math.tanh %53 : vector<8x32xf32>
    %55 = arith.mulf %50, %54 : vector<8x32xf32>
    %56 = vector.extract_strided_slice %5 {offsets = [24, 0], sizes = [8, 128], strides = [1, 1]} : vector<64x128xf32> to vector<8x128xf32>
    %cst_12 = arith.constant dense<0.000000e+00> : vector<8x128xf32>
    %57 = tpu.matmul %55, %6, %cst_12 {dimension_numbers = #tpu.dot_dimension_numbers<[1], [0], [0], [1], [0, 0, 1, 1], [], []>} : vector<8x32xf32>, vector<32x128xf32>, vector<8x128xf32> -> vector<8x128xf32>
    %58 = arith.addf %56, %57 : vector<8x128xf32>
    %59 = arith.negf %58 : vector<8x128xf32>
    %60 = math.exp %59 : vector<8x128xf32>
    %cst_13 = arith.constant 1.000000e+00 : f32
    %61 = vector.broadcast %cst_13 : f32 to vector<8x128xf32>
    %62 = arith.addf %61, %60 : vector<8x128xf32>
    %63 = arith.divf %61, %62 : vector<8x128xf32>
    %64 = math.tanh %58 : vector<8x128xf32>
    %65 = vector.extract_strided_slice %63 {offsets = [0, 0], sizes = [8, 32], strides = [1, 1]} : vector<8x128xf32> to vector<8x32xf32>
    %66 = vector.extract_strided_slice %63 {offsets = [0, 32], sizes = [8, 32], strides = [1, 1]} : vector<8x128xf32> to vector<8x32xf32>
    %67 = vector.extract_strided_slice %64 {offsets = [0, 64], sizes = [8, 32], strides = [1, 1]} : vector<8x128xf32> to vector<8x32xf32>
    %68 = vector.extract_strided_slice %63 {offsets = [0, 96], sizes = [8, 32], strides = [1, 1]} : vector<8x128xf32> to vector<8x32xf32>
    %69 = arith.mulf %66, %53 : vector<8x32xf32>
    %70 = arith.mulf %65, %67 : vector<8x32xf32>
    %71 = arith.addf %69, %70 : vector<8x32xf32>
    %72 = math.tanh %71 : vector<8x32xf32>
    %73 = arith.mulf %68, %72 : vector<8x32xf32>
    %74 = vector.extract_strided_slice %5 {offsets = [32, 0], sizes = [8, 128], strides = [1, 1]} : vector<64x128xf32> to vector<8x128xf32>
    %cst_14 = arith.constant dense<0.000000e+00> : vector<8x128xf32>
    %75 = tpu.matmul %73, %6, %cst_14 {dimension_numbers = #tpu.dot_dimension_numbers<[1], [0], [0], [1], [0, 0, 1, 1], [], []>} : vector<8x32xf32>, vector<32x128xf32>, vector<8x128xf32> -> vector<8x128xf32>
    %76 = arith.addf %74, %75 : vector<8x128xf32>
    %77 = arith.negf %76 : vector<8x128xf32>
    %78 = math.exp %77 : vector<8x128xf32>
    %cst_15 = arith.constant 1.000000e+00 : f32
    %79 = vector.broadcast %cst_15 : f32 to vector<8x128xf32>
    %80 = arith.addf %79, %78 : vector<8x128xf32>
    %81 = arith.divf %79, %80 : vector<8x128xf32>
    %82 = math.tanh %76 : vector<8x128xf32>
    %83 = vector.extract_strided_slice %81 {offsets = [0, 0], sizes = [8, 32], strides = [1, 1]} : vector<8x128xf32> to vector<8x32xf32>
    %84 = vector.extract_strided_slice %81 {offsets = [0, 32], sizes = [8, 32], strides = [1, 1]} : vector<8x128xf32> to vector<8x32xf32>
    %85 = vector.extract_strided_slice %82 {offsets = [0, 64], sizes = [8, 32], strides = [1, 1]} : vector<8x128xf32> to vector<8x32xf32>
    %86 = vector.extract_strided_slice %81 {offsets = [0, 96], sizes = [8, 32], strides = [1, 1]} : vector<8x128xf32> to vector<8x32xf32>
    %87 = arith.mulf %84, %71 : vector<8x32xf32>
    %88 = arith.mulf %83, %85 : vector<8x32xf32>
    %89 = arith.addf %87, %88 : vector<8x32xf32>
    %90 = math.tanh %89 : vector<8x32xf32>
    %91 = arith.mulf %86, %90 : vector<8x32xf32>
    %92 = vector.extract_strided_slice %5 {offsets = [40, 0], sizes = [8, 128], strides = [1, 1]} : vector<64x128xf32> to vector<8x128xf32>
    %cst_16 = arith.constant dense<0.000000e+00> : vector<8x128xf32>
    %93 = tpu.matmul %91, %6, %cst_16 {dimension_numbers = #tpu.dot_dimension_numbers<[1], [0], [0], [1], [0, 0, 1, 1], [], []>} : vector<8x32xf32>, vector<32x128xf32>, vector<8x128xf32> -> vector<8x128xf32>
    %94 = arith.addf %92, %93 : vector<8x128xf32>
    %95 = arith.negf %94 : vector<8x128xf32>
    %96 = math.exp %95 : vector<8x128xf32>
    %cst_17 = arith.constant 1.000000e+00 : f32
    %97 = vector.broadcast %cst_17 : f32 to vector<8x128xf32>
    %98 = arith.addf %97, %96 : vector<8x128xf32>
    %99 = arith.divf %97, %98 : vector<8x128xf32>
    %100 = math.tanh %94 : vector<8x128xf32>
    %101 = vector.extract_strided_slice %99 {offsets = [0, 0], sizes = [8, 32], strides = [1, 1]} : vector<8x128xf32> to vector<8x32xf32>
    %102 = vector.extract_strided_slice %99 {offsets = [0, 32], sizes = [8, 32], strides = [1, 1]} : vector<8x128xf32> to vector<8x32xf32>
    %103 = vector.extract_strided_slice %100 {offsets = [0, 64], sizes = [8, 32], strides = [1, 1]} : vector<8x128xf32> to vector<8x32xf32>
    %104 = vector.extract_strided_slice %99 {offsets = [0, 96], sizes = [8, 32], strides = [1, 1]} : vector<8x128xf32> to vector<8x32xf32>
    %105 = arith.mulf %102, %89 : vector<8x32xf32>
    %106 = arith.mulf %101, %103 : vector<8x32xf32>
    %107 = arith.addf %105, %106 : vector<8x32xf32>
    %108 = math.tanh %107 : vector<8x32xf32>
    %109 = arith.mulf %104, %108 : vector<8x32xf32>
    %110 = vector.extract_strided_slice %5 {offsets = [48, 0], sizes = [8, 128], strides = [1, 1]} : vector<64x128xf32> to vector<8x128xf32>
    %cst_18 = arith.constant dense<0.000000e+00> : vector<8x128xf32>
    %111 = tpu.matmul %109, %6, %cst_18 {dimension_numbers = #tpu.dot_dimension_numbers<[1], [0], [0], [1], [0, 0, 1, 1], [], []>} : vector<8x32xf32>, vector<32x128xf32>, vector<8x128xf32> -> vector<8x128xf32>
    %112 = arith.addf %110, %111 : vector<8x128xf32>
    %113 = arith.negf %112 : vector<8x128xf32>
    %114 = math.exp %113 : vector<8x128xf32>
    %cst_19 = arith.constant 1.000000e+00 : f32
    %115 = vector.broadcast %cst_19 : f32 to vector<8x128xf32>
    %116 = arith.addf %115, %114 : vector<8x128xf32>
    %117 = arith.divf %115, %116 : vector<8x128xf32>
    %118 = math.tanh %112 : vector<8x128xf32>
    %119 = vector.extract_strided_slice %117 {offsets = [0, 0], sizes = [8, 32], strides = [1, 1]} : vector<8x128xf32> to vector<8x32xf32>
    %120 = vector.extract_strided_slice %117 {offsets = [0, 32], sizes = [8, 32], strides = [1, 1]} : vector<8x128xf32> to vector<8x32xf32>
    %121 = vector.extract_strided_slice %118 {offsets = [0, 64], sizes = [8, 32], strides = [1, 1]} : vector<8x128xf32> to vector<8x32xf32>
    %122 = vector.extract_strided_slice %117 {offsets = [0, 96], sizes = [8, 32], strides = [1, 1]} : vector<8x128xf32> to vector<8x32xf32>
    %123 = arith.mulf %120, %107 : vector<8x32xf32>
    %124 = arith.mulf %119, %121 : vector<8x32xf32>
    %125 = arith.addf %123, %124 : vector<8x32xf32>
    %126 = math.tanh %125 : vector<8x32xf32>
    %127 = arith.mulf %122, %126 : vector<8x32xf32>
    %128 = vector.extract_strided_slice %5 {offsets = [56, 0], sizes = [8, 128], strides = [1, 1]} : vector<64x128xf32> to vector<8x128xf32>
    %cst_20 = arith.constant dense<0.000000e+00> : vector<8x128xf32>
    %129 = tpu.matmul %127, %6, %cst_20 {dimension_numbers = #tpu.dot_dimension_numbers<[1], [0], [0], [1], [0, 0, 1, 1], [], []>} : vector<8x32xf32>, vector<32x128xf32>, vector<8x128xf32> -> vector<8x128xf32>
    %130 = arith.addf %128, %129 : vector<8x128xf32>
    %131 = arith.negf %130 : vector<8x128xf32>
    %132 = math.exp %131 : vector<8x128xf32>
    %cst_21 = arith.constant 1.000000e+00 : f32
    %133 = vector.broadcast %cst_21 : f32 to vector<8x128xf32>
    %134 = arith.addf %133, %132 : vector<8x128xf32>
    %135 = arith.divf %133, %134 : vector<8x128xf32>
    %136 = math.tanh %130 : vector<8x128xf32>
    %137 = vector.extract_strided_slice %135 {offsets = [0, 0], sizes = [8, 32], strides = [1, 1]} : vector<8x128xf32> to vector<8x32xf32>
    %138 = vector.extract_strided_slice %135 {offsets = [0, 32], sizes = [8, 32], strides = [1, 1]} : vector<8x128xf32> to vector<8x32xf32>
    %139 = vector.extract_strided_slice %136 {offsets = [0, 64], sizes = [8, 32], strides = [1, 1]} : vector<8x128xf32> to vector<8x32xf32>
    %140 = vector.extract_strided_slice %135 {offsets = [0, 96], sizes = [8, 32], strides = [1, 1]} : vector<8x128xf32> to vector<8x32xf32>
    %141 = arith.mulf %138, %125 : vector<8x32xf32>
    %142 = arith.mulf %137, %139 : vector<8x32xf32>
    %143 = arith.addf %141, %142 : vector<8x32xf32>
    %144 = math.tanh %143 : vector<8x32xf32>
    %145 = arith.mulf %140, %144 : vector<8x32xf32>
    %c0_22 = arith.constant 0 : index
    %c0_23 = arith.constant 0 : index
    %146 = vector.load %arg4[%c0_22, %c0_23] : memref<32x64xf32, #tpu.memory_space<vmem>>, vector<32x64xf32>
    %cst_24 = arith.constant dense<0.000000e+00> : vector<8x64xf32>
    %147 = tpu.matmul %145, %146, %cst_24 {dimension_numbers = #tpu.dot_dimension_numbers<[1], [0], [0], [1], [0, 0, 1, 1], [], []>} : vector<8x32xf32>, vector<32x64xf32>, vector<8x64xf32> -> vector<8x64xf32>
    %c0_25 = arith.constant 0 : index
    %c0_26 = arith.constant 0 : index
    %148 = vector.load %arg6[%c0_25, %c0_26] : memref<1x64xf32, #tpu.memory_space<vmem>>, vector<1x64xf32>
    %149 = vector.broadcast %148 : vector<1x64xf32> to vector<8x64xf32>
    %150 = arith.addf %147, %149 : vector<8x64xf32>
    %c0_27 = arith.constant 0 : index
    %c0_28 = arith.constant 0 : index
    %151 = vector.load %arg5[%c0_27, %c0_28] : memref<16x64xf32, #tpu.memory_space<vmem>>, vector<16x64xf32>
    %152 = arith.negf %150 : vector<8x64xf32>
    %153 = math.exp %152 : vector<8x64xf32>
    %cst_29 = arith.constant 1.000000e+00 : f32
    %154 = vector.broadcast %cst_29 : f32 to vector<8x64xf32>
    %155 = arith.addf %154, %153 : vector<8x64xf32>
    %156 = arith.divf %154, %155 : vector<8x64xf32>
    %157 = math.tanh %150 : vector<8x64xf32>
    %158 = vector.extract_strided_slice %156 {offsets = [0, 0], sizes = [8, 16], strides = [1, 1]} : vector<8x64xf32> to vector<8x16xf32>
    %159 = vector.extract_strided_slice %157 {offsets = [0, 32], sizes = [8, 16], strides = [1, 1]} : vector<8x64xf32> to vector<8x16xf32>
    %160 = vector.extract_strided_slice %156 {offsets = [0, 48], sizes = [8, 16], strides = [1, 1]} : vector<8x64xf32> to vector<8x16xf32>
    %161 = arith.mulf %158, %159 : vector<8x16xf32>
    %162 = math.tanh %161 : vector<8x16xf32>
    %163 = arith.mulf %160, %162 : vector<8x16xf32>
    %cst_30 = arith.constant dense<0.000000e+00> : vector<8x64xf32>
    %164 = tpu.matmul %163, %151, %cst_30 {dimension_numbers = #tpu.dot_dimension_numbers<[1], [0], [0], [1], [0, 0, 1, 1], [], []>} : vector<8x16xf32>, vector<16x64xf32>, vector<8x64xf32> -> vector<8x64xf32>
    %165 = arith.addf %150, %164 : vector<8x64xf32>
    %166 = arith.negf %165 : vector<8x64xf32>
    %167 = math.exp %166 : vector<8x64xf32>
    %cst_31 = arith.constant 1.000000e+00 : f32
    %168 = vector.broadcast %cst_31 : f32 to vector<8x64xf32>
    %169 = arith.addf %168, %167 : vector<8x64xf32>
    %170 = arith.divf %168, %169 : vector<8x64xf32>
    %171 = math.tanh %165 : vector<8x64xf32>
    %172 = vector.extract_strided_slice %170 {offsets = [0, 0], sizes = [8, 16], strides = [1, 1]} : vector<8x64xf32> to vector<8x16xf32>
    %173 = vector.extract_strided_slice %170 {offsets = [0, 16], sizes = [8, 16], strides = [1, 1]} : vector<8x64xf32> to vector<8x16xf32>
    %174 = vector.extract_strided_slice %171 {offsets = [0, 32], sizes = [8, 16], strides = [1, 1]} : vector<8x64xf32> to vector<8x16xf32>
    %175 = vector.extract_strided_slice %170 {offsets = [0, 48], sizes = [8, 16], strides = [1, 1]} : vector<8x64xf32> to vector<8x16xf32>
    %176 = arith.mulf %173, %161 : vector<8x16xf32>
    %177 = arith.mulf %172, %174 : vector<8x16xf32>
    %178 = arith.addf %176, %177 : vector<8x16xf32>
    %179 = math.tanh %178 : vector<8x16xf32>
    %180 = arith.mulf %175, %179 : vector<8x16xf32>
    %cst_32 = arith.constant dense<0.000000e+00> : vector<8x64xf32>
    %181 = tpu.matmul %180, %151, %cst_32 {dimension_numbers = #tpu.dot_dimension_numbers<[1], [0], [0], [1], [0, 0, 1, 1], [], []>} : vector<8x16xf32>, vector<16x64xf32>, vector<8x64xf32> -> vector<8x64xf32>
    %182 = arith.addf %150, %181 : vector<8x64xf32>
    %183 = arith.negf %182 : vector<8x64xf32>
    %184 = math.exp %183 : vector<8x64xf32>
    %cst_33 = arith.constant 1.000000e+00 : f32
    %185 = vector.broadcast %cst_33 : f32 to vector<8x64xf32>
    %186 = arith.addf %185, %184 : vector<8x64xf32>
    %187 = arith.divf %185, %186 : vector<8x64xf32>
    %188 = math.tanh %182 : vector<8x64xf32>
    %189 = vector.extract_strided_slice %187 {offsets = [0, 0], sizes = [8, 16], strides = [1, 1]} : vector<8x64xf32> to vector<8x16xf32>
    %190 = vector.extract_strided_slice %187 {offsets = [0, 16], sizes = [8, 16], strides = [1, 1]} : vector<8x64xf32> to vector<8x16xf32>
    %191 = vector.extract_strided_slice %188 {offsets = [0, 32], sizes = [8, 16], strides = [1, 1]} : vector<8x64xf32> to vector<8x16xf32>
    %192 = vector.extract_strided_slice %187 {offsets = [0, 48], sizes = [8, 16], strides = [1, 1]} : vector<8x64xf32> to vector<8x16xf32>
    %193 = arith.mulf %190, %178 : vector<8x16xf32>
    %194 = arith.mulf %189, %191 : vector<8x16xf32>
    %195 = arith.addf %193, %194 : vector<8x16xf32>
    %196 = math.tanh %195 : vector<8x16xf32>
    %197 = arith.mulf %192, %196 : vector<8x16xf32>
    %cst_34 = arith.constant dense<0.000000e+00> : vector<8x64xf32>
    %198 = tpu.matmul %197, %151, %cst_34 {dimension_numbers = #tpu.dot_dimension_numbers<[1], [0], [0], [1], [0, 0, 1, 1], [], []>} : vector<8x16xf32>, vector<16x64xf32>, vector<8x64xf32> -> vector<8x64xf32>
    %199 = arith.addf %150, %198 : vector<8x64xf32>
    %200 = arith.negf %199 : vector<8x64xf32>
    %201 = math.exp %200 : vector<8x64xf32>
    %cst_35 = arith.constant 1.000000e+00 : f32
    %202 = vector.broadcast %cst_35 : f32 to vector<8x64xf32>
    %203 = arith.addf %202, %201 : vector<8x64xf32>
    %204 = arith.divf %202, %203 : vector<8x64xf32>
    %205 = math.tanh %199 : vector<8x64xf32>
    %206 = vector.extract_strided_slice %204 {offsets = [0, 0], sizes = [8, 16], strides = [1, 1]} : vector<8x64xf32> to vector<8x16xf32>
    %207 = vector.extract_strided_slice %204 {offsets = [0, 16], sizes = [8, 16], strides = [1, 1]} : vector<8x64xf32> to vector<8x16xf32>
    %208 = vector.extract_strided_slice %205 {offsets = [0, 32], sizes = [8, 16], strides = [1, 1]} : vector<8x64xf32> to vector<8x16xf32>
    %209 = vector.extract_strided_slice %204 {offsets = [0, 48], sizes = [8, 16], strides = [1, 1]} : vector<8x64xf32> to vector<8x16xf32>
    %210 = arith.mulf %207, %195 : vector<8x16xf32>
    %211 = arith.mulf %206, %208 : vector<8x16xf32>
    %212 = arith.addf %210, %211 : vector<8x16xf32>
    %213 = math.tanh %212 : vector<8x16xf32>
    %214 = arith.mulf %209, %213 : vector<8x16xf32>
    %cst_36 = arith.constant dense<0.000000e+00> : vector<8x64xf32>
    %215 = tpu.matmul %214, %151, %cst_36 {dimension_numbers = #tpu.dot_dimension_numbers<[1], [0], [0], [1], [0, 0, 1, 1], [], []>} : vector<8x16xf32>, vector<16x64xf32>, vector<8x64xf32> -> vector<8x64xf32>
    %216 = arith.addf %150, %215 : vector<8x64xf32>
    %217 = arith.negf %216 : vector<8x64xf32>
    %218 = math.exp %217 : vector<8x64xf32>
    %cst_37 = arith.constant 1.000000e+00 : f32
    %219 = vector.broadcast %cst_37 : f32 to vector<8x64xf32>
    %220 = arith.addf %219, %218 : vector<8x64xf32>
    %221 = arith.divf %219, %220 : vector<8x64xf32>
    %222 = math.tanh %216 : vector<8x64xf32>
    %223 = vector.extract_strided_slice %221 {offsets = [0, 0], sizes = [8, 16], strides = [1, 1]} : vector<8x64xf32> to vector<8x16xf32>
    %224 = vector.extract_strided_slice %221 {offsets = [0, 16], sizes = [8, 16], strides = [1, 1]} : vector<8x64xf32> to vector<8x16xf32>
    %225 = vector.extract_strided_slice %222 {offsets = [0, 32], sizes = [8, 16], strides = [1, 1]} : vector<8x64xf32> to vector<8x16xf32>
    %226 = vector.extract_strided_slice %221 {offsets = [0, 48], sizes = [8, 16], strides = [1, 1]} : vector<8x64xf32> to vector<8x16xf32>
    %227 = arith.mulf %224, %212 : vector<8x16xf32>
    %228 = arith.mulf %223, %225 : vector<8x16xf32>
    %229 = arith.addf %227, %228 : vector<8x16xf32>
    %230 = math.tanh %229 : vector<8x16xf32>
    %231 = arith.mulf %226, %230 : vector<8x16xf32>
    %cst_38 = arith.constant dense<0.000000e+00> : vector<8x64xf32>
    %232 = tpu.matmul %231, %151, %cst_38 {dimension_numbers = #tpu.dot_dimension_numbers<[1], [0], [0], [1], [0, 0, 1, 1], [], []>} : vector<8x16xf32>, vector<16x64xf32>, vector<8x64xf32> -> vector<8x64xf32>
    %233 = arith.addf %150, %232 : vector<8x64xf32>
    %234 = arith.negf %233 : vector<8x64xf32>
    %235 = math.exp %234 : vector<8x64xf32>
    %cst_39 = arith.constant 1.000000e+00 : f32
    %236 = vector.broadcast %cst_39 : f32 to vector<8x64xf32>
    %237 = arith.addf %236, %235 : vector<8x64xf32>
    %238 = arith.divf %236, %237 : vector<8x64xf32>
    %239 = math.tanh %233 : vector<8x64xf32>
    %240 = vector.extract_strided_slice %238 {offsets = [0, 0], sizes = [8, 16], strides = [1, 1]} : vector<8x64xf32> to vector<8x16xf32>
    %241 = vector.extract_strided_slice %238 {offsets = [0, 16], sizes = [8, 16], strides = [1, 1]} : vector<8x64xf32> to vector<8x16xf32>
    %242 = vector.extract_strided_slice %239 {offsets = [0, 32], sizes = [8, 16], strides = [1, 1]} : vector<8x64xf32> to vector<8x16xf32>
    %243 = vector.extract_strided_slice %238 {offsets = [0, 48], sizes = [8, 16], strides = [1, 1]} : vector<8x64xf32> to vector<8x16xf32>
    %244 = arith.mulf %241, %229 : vector<8x16xf32>
    %245 = arith.mulf %240, %242 : vector<8x16xf32>
    %246 = arith.addf %244, %245 : vector<8x16xf32>
    %247 = math.tanh %246 : vector<8x16xf32>
    %248 = arith.mulf %243, %247 : vector<8x16xf32>
    %cst_40 = arith.constant dense<0.000000e+00> : vector<8x64xf32>
    %249 = tpu.matmul %248, %151, %cst_40 {dimension_numbers = #tpu.dot_dimension_numbers<[1], [0], [0], [1], [0, 0, 1, 1], [], []>} : vector<8x16xf32>, vector<16x64xf32>, vector<8x64xf32> -> vector<8x64xf32>
    %250 = arith.addf %150, %249 : vector<8x64xf32>
    %251 = arith.negf %250 : vector<8x64xf32>
    %252 = math.exp %251 : vector<8x64xf32>
    %cst_41 = arith.constant 1.000000e+00 : f32
    %253 = vector.broadcast %cst_41 : f32 to vector<8x64xf32>
    %254 = arith.addf %253, %252 : vector<8x64xf32>
    %255 = arith.divf %253, %254 : vector<8x64xf32>
    %256 = math.tanh %250 : vector<8x64xf32>
    %257 = vector.extract_strided_slice %255 {offsets = [0, 0], sizes = [8, 16], strides = [1, 1]} : vector<8x64xf32> to vector<8x16xf32>
    %258 = vector.extract_strided_slice %255 {offsets = [0, 16], sizes = [8, 16], strides = [1, 1]} : vector<8x64xf32> to vector<8x16xf32>
    %259 = vector.extract_strided_slice %256 {offsets = [0, 32], sizes = [8, 16], strides = [1, 1]} : vector<8x64xf32> to vector<8x16xf32>
    %260 = vector.extract_strided_slice %255 {offsets = [0, 48], sizes = [8, 16], strides = [1, 1]} : vector<8x64xf32> to vector<8x16xf32>
    %261 = arith.mulf %258, %246 : vector<8x16xf32>
    %262 = arith.mulf %257, %259 : vector<8x16xf32>
    %263 = arith.addf %261, %262 : vector<8x16xf32>
    %264 = math.tanh %263 : vector<8x16xf32>
    %265 = arith.mulf %260, %264 : vector<8x16xf32>
    %cst_42 = arith.constant dense<0.000000e+00> : vector<8x64xf32>
    %266 = tpu.matmul %265, %151, %cst_42 {dimension_numbers = #tpu.dot_dimension_numbers<[1], [0], [0], [1], [0, 0, 1, 1], [], []>} : vector<8x16xf32>, vector<16x64xf32>, vector<8x64xf32> -> vector<8x64xf32>
    %267 = arith.addf %150, %266 : vector<8x64xf32>
    %268 = arith.negf %267 : vector<8x64xf32>
    %269 = math.exp %268 : vector<8x64xf32>
    %cst_43 = arith.constant 1.000000e+00 : f32
    %270 = vector.broadcast %cst_43 : f32 to vector<8x64xf32>
    %271 = arith.addf %270, %269 : vector<8x64xf32>
    %272 = arith.divf %270, %271 : vector<8x64xf32>
    %273 = math.tanh %267 : vector<8x64xf32>
    %274 = vector.extract_strided_slice %272 {offsets = [0, 0], sizes = [8, 16], strides = [1, 1]} : vector<8x64xf32> to vector<8x16xf32>
    %275 = vector.extract_strided_slice %272 {offsets = [0, 16], sizes = [8, 16], strides = [1, 1]} : vector<8x64xf32> to vector<8x16xf32>
    %276 = vector.extract_strided_slice %273 {offsets = [0, 32], sizes = [8, 16], strides = [1, 1]} : vector<8x64xf32> to vector<8x16xf32>
    %277 = vector.extract_strided_slice %272 {offsets = [0, 48], sizes = [8, 16], strides = [1, 1]} : vector<8x64xf32> to vector<8x16xf32>
    %278 = arith.mulf %275, %263 : vector<8x16xf32>
    %279 = arith.mulf %274, %276 : vector<8x16xf32>
    %280 = arith.addf %278, %279 : vector<8x16xf32>
    %281 = math.tanh %280 : vector<8x16xf32>
    %282 = arith.mulf %277, %281 : vector<8x16xf32>
    %283 = tpu.concatenate %163, %180, %197, %214, %231, %248, %265, %282 in 1 : vector<8x16xf32>, vector<8x16xf32>, vector<8x16xf32>, vector<8x16xf32>, vector<8x16xf32>, vector<8x16xf32>, vector<8x16xf32>, vector<8x16xf32> -> vector<8x128xf32>
    %c0_44 = arith.constant 0 : index
    %c0_45 = arith.constant 0 : index
    %284 = vector.load %arg7[%c0_44, %c0_45] : memref<8x128xf32, #tpu.memory_space<vmem>>, vector<8x128xf32>
    tpu.vector_store %arg7[%c0_44, %c0_45], %283 {strides = array<i32>} : memref<8x128xf32, #tpu.memory_space<vmem>>, vector<8x128xf32>,
    return
  }
}

</mosaic_0001>

<bundles_post_ra>
// kernel: lstm_autoencoder.1
= control target key start
LH: loop header
LB: loop body
LE: loop exit
PB: predicated region body
PF: predicated region fallthrough
CT: control target
= control target key end

     0   :  { %vm43_vm0 = vcmask 130048   ;;  %v2224_v16 = vmov 0.0|0.0   ;;  %vm2225_vm1 = vmmov 0   ;;  %v2226_v20 = vmov 0.0   ;;  %s2228_s18 = smov 32   ;;  %s2229_s19 = smov 48   ;;  %s2565_s1 = inlined_call_operand.vmem [shape: f32[16,128], index: 1, kind: input, shape index: {}]   ;;  %s2566_s0 = inlined_call_operand.vmem [shape: f32[64,16], index: 0, kind: input, shape index: {}]   ;;  %s2567_s3 = inlined_call_operand.vmem [shape: f32[1,128], index: 3, kind: input, shape index: {}]   ;;  %s2568_s2 = inlined_call_operand.vmem [shape: f32[32,128], index: 2, kind: input, shape index: {}]   ;;  %s2569_s4 = inlined_call_operand.vmem [shape: f32[32,64], index: 4, kind: input, shape index: {}]   ;;  %s2570_s6 = inlined_call_operand.vmem [shape: f32[1,64], index: 6, kind: input, shape index: {}]   ;;  %s2571_s5 = inlined_call_operand.vmem [shape: f32[16,64], index: 5, kind: input, shape index: {}]   ;;  %s2572_s7 = inlined_call_operand.vmem [shape: f32[8,128], index: 7, kind: output, shape index: {}]  }
   0x1   :  { %v34_v0 = vld [vmem:[%s2565_s1] sm:$0xff]  ;;  %v35_v1 = vld [vmem:[%s2565_s1 + $0x8] sm:$0xff]  ;;  %s2223_s1 = smov 64   ;;  %2016 = vmatprep.subr.bf16.mxu1 %v2224_v16  ;;  %v175_v19 = vld [vmem:[%s2568_s2 + $0x10] sm:$0xff]  ;;  %1883 = vmatprep.mubr.msk.f32.mxu1 %vm2225_vm1, %v2226_v20  ;;  %vm198_vm2 = vcmask 261120   ;;  %s2230_s20 = smov 80  }
   0x2   :  { %v26_v2 = vld [vmem:[%s2566_s0] sm:$0xff]  ;;  %v2012_v3 = vpack.c.bf16 %v35_v1, %v34_v0  ;;  %v27_v4 = vld [vmem:[%s2566_s0 + $0x8] sm:$0xff]  ;;  %v176_v22 = vld [vmem:[%s2568_s2 + $0x18] sm:$0xff]  ;;  %s2232_s21 = smov 112   ;;  %vm1732_vm3 = vcmask 392192   ;;  %vm1734_vm4 = vcmask 523264  }
   0x3   :  { %1863 = vmatprep.mubr.msk.f32.mxu0 %vm43_vm0, %v26_v2  ;;  %v2290_v5 = vld [vmem:[%s2567_s3] ss:$0 sm:$0xff]  ;;  %v174_v18 = vld [vmem:[%s2568_s2 + $0x8] sm:$0xff]  ;;  %v2313_v23 = vpack.c.bf16 %v176_v22, %v175_v19  ;;  %v28_v43 = vld [vmem:[%s2566_s0 + $0x10] sm:$0xff]  ;;  %vm1736_vm5 = vcmask 654336   ;;  %vm1738_vm6 = vcmask 785408  }
   0x4   :  { %2013 = vmatprep.subr.bf16.mxu0 %v2012_v3  ;;  %v173_v17 = vld [vmem:[%s2568_s2] sm:$0xff]  ;;  %s2227_s2 = smov 96   ;;  %v29_v44 = vld [vmem:[%s2566_s0 + $0x18] sm:$0xff]  ;;  %v31_v2 = vld [vmem:[%s2566_s0 + $0x28] sm:$0xff]  ;;  %vm1740_vm7 = vcmask 916480  }
   0x5   :  { %2015 = vmatpush3.bf16.msra.mxu0 %v2012_v3  ;;  %v2306_v21 = vpack.c.bf16 %v174_v18, %v173_v17  ;;  %v30_v1 = vld [vmem:[%s2566_s0 + $0x20] sm:$0xff]  ;;  %v32_v3 = vld [vmem:[%s2566_s0 + $0x30] sm:$0xff] }
   0x6   :  { %2028 = vmatprep.subr.bf16.mxu0 %v2224_v16 }
   0x7   :  { %2018 = vmatpush3.bf16.msra.mxu1 %v2306_v21 }
   0x8   :  { %1864 = vmatmul.mubr.msk.f32.vlgmr.msra.gmra.mrb[0].mxu0 %vm43_vm0, %v27_v4  ;;  %2019 = vmatprep.subr.bf16.mxu1 %v2224_v16  ;;  %v33_v4 = vld [vmem:[%s2566_s0 + $0x38] sm:$0xff] }
   0x9   :  { %2030 = vmatpush3.bf16.msra.mxu0 %v2306_v21  ;;  %1866 = vmatprep.mubr.msk.f32.mxu0 %vm43_vm0, %v28_v43 }
   0xa   :  { %2031 = vmatprep.subr.bf16.mxu0 %v2224_v16 }
   0xb   :  { %2021 = vmatpush3.bf16.msra.mxu1 %v2313_v23 }
   0xc   :  { %2022 = vmatprep.subr.bf16.mxu1 %v2224_v16  ;;  %1867 = vmatmul.mubr.msk.f32.gmra.mrb[2].mxu0 %vm43_vm0, %v29_v44 }
   0xd   :  { %2033 = vmatpush3.bf16.msra.mxu0 %v2313_v23  ;;  %1869 = vmatprep.mubr.msk.f32.mxu0 %vm43_vm0, %v30_v1 }
   0xe   :  { %2040 = vmatprep.subr.bf16.mxu0 %v2224_v16 }
  0x10   :  { %1870 = vmatmul.mubr.msk.f32.gmra.mrb[4].mxu0 %vm43_vm0, %v31_v2 }
  0x11   :  { %1872 = vmatprep.mubr.msk.f32.mxu0 %vm43_vm0, %v32_v3 }
  0x14   :  { %1873 = vmatmul.mubr.msk.f32.gmra.mrb[6].mxu0 %vm43_vm0, %v33_v4 }
  0x15   :  { %1905 = vmatprep.mubr.msk.f32.mxu0 %vm2225_vm1, %v2226_v20 }
  0xdb   :  { %v1865_v6 = vpop.f32.mrb[0].mxu0 }
  0xdc   :  { %v134_v7 = vpop.f32.mrb[1].mxu0  ;;  %v140_v28 = vadd.f32 %v1865_v6, %v2290_v5 }
  0xdd   :  { %v135_v8 = vadd.f32 %v2290_v5, %v134_v7 }
  0xdf   :  { %2095 = vtanh.f32 %v135_v8  ;;  %v1756_v10 = vmul.f32 -1.442695, %v135_v8  ;;  %v1868_v48 = vpop.f32.mrb[2].mxu0 }
  0xe0   :  { %v144_v49 = vpop.f32.mrb[3].mxu0 }
  0xe1   :  { %2097 = vpow2.f32 %v1756_v10  ;;  %v145_v51 = vadd.f32 %v2290_v5, %v144_v49 }
  0xe9   :  { %v2096_v9 = vpop.eup %2095 }
  0xea   :  { %185 = vrot.lane.b32.xlu0 %v2096_v9, %s2223_s1  ;;  %v2375_v9 = vpop.f32.mrb[4].mxu0 }
  0xeb   :  { %v2098_v11 = vpop.eup %2097  ;;  %v154_v10 = vpop.f32.mrb[5].mxu0 }
  0xec   :  { %v180_v12 = vadd.f32 1.0, %v2098_v11  ;;  %v2377_v11 = vpop.f32.mrb[6].mxu0 }
  0xee   :  { %2099 = vrcp.f32 %v180_v12  ;;  %v2379_v12 = vpop.f32.mrb[7].mxu0 }
  0xf8   :  { %v2100_v13 = vpop.eup %2099 }
 0x15c   :  { %v186_v14 = vpop.permute.xlu0 %185 }
 0x15d   :  { %v188_v15 = vmul.f32 %v2100_v13, %v186_v14  ;;  %v150_v14 = vadd.f32 %v1868_v48, %v2290_v5 }
 0x15f   :  { %2101 = vtanh.f32 %v188_v15 }
 0x169   :  { %v2102_v24 = vpop.eup %2101 }
 0x16a   :  { %191 = vrot.lane.b32.xlu0 %v2102_v24, %s2227_s2 }
 0x16e   :  { %280 = vrot.lane.b32.xlu0 %v188_v15, %s2228_s18 }
 0x1dc   :  { %v192_v25 = vpop.permute.xlu0 %191 }
 0x1dd   :  { %v194_v26 = vmul.f32 %v2100_v13, %v192_v25 }
 0x1df   :  { %196 = vrot.lane.b32.xlu1 %v194_v26, %s2228_s18 }
 0x1e0   :  { %v281_v39 = vpop.permute.xlu0 %280 }
 0x251   :  { %v197_v27 = vpop.permute.xlu1 %196 }
 0x252   :  { %1884 = vmatmul.mubr.msk.f32.vlgmr.msra.gmra.mrb[0].mxu1 %vm198_vm2, %v197_v27 }
 0x253   :  { %2024 = vmatpush3.bf16.msra.mxu1 %v2306_v21  ;;  %1894 = vmatprep.mubr.msk.f32.mxu1 %vm2225_vm1, %v2226_v20 }
 0x254   :  { %2025 = vmatprep.subr.bf16.mxu1 %v2224_v16 }
 0x257   :  { %2027 = vmatpush3.bf16.msra.mxu1 %v2313_v23 }
 0x258   :  { %2034 = vmatprep.subr.bf16.mxu1 %v2224_v16 }
 0x325   :  { %v267_v29 = vpop.f32.mrb[0].mxu1 }
 0x326   :  { %v271_v30 = vadd.f32 %v267_v29, %v140_v28  ;;  %v1885_v31 = vpop.f32.mrb[1].mxu1 }
 0x328   :  { %2103 = vtanh.f32 %v271_v30  ;;  %v1758_v33 = vmul.f32 -1.442695, %v271_v30 }
 0x32a   :  { %2105 = vpow2.f32 %v1758_v33 }
 0x332   :  { %v2104_v32 = vpop.eup %2103 }
 0x333   :  { %285 = vrot.lane.b32.xlu1 %v2104_v32, %s2223_s1 }
 0x334   :  { %v2106_v34 = vpop.eup %2105 }
 0x335   :  { %v275_v35 = vadd.f32 1.0, %v2106_v34 }
 0x337   :  { %2107 = vrcp.f32 %v275_v35 }
 0x341   :  { %v2108_v36 = vpop.eup %2107 }
 0x342   :  { %v283_v40 = vmul.f32 %v2108_v36, %v281_v39 }
 0x3a5   :  { %v286_v37 = vpop.permute.xlu1 %285 }
 0x3a6   :  { %v288_v38 = vmul.f32 %v2108_v36, %v286_v37 }
 0x3a8   :  { %290 = vrot.lane.b32.xlu1 %v288_v38, %s2228_s18 }
 0x41a   :  { %v291_v41 = vpop.permute.xlu1 %290 }
 0x41b   :  { %v293_v42 = vadd.f32 %v291_v41, %v283_v40 }
 0x41d   :  { %2109 = vtanh.f32 %v293_v42 }
 0x427   :  { %v2110_v45 = vpop.eup %2109 }
 0x428   :  { %296 = vrot.lane.b32.xlu0 %v2110_v45, %s2223_s1 }
 0x49a   :  { %v297_v46 = vpop.permute.xlu0 %296 }
 0x49b   :  { %v299_v47 = vmul.f32 %v2108_v36, %v297_v46  ;;  %v155_v36 = vadd.f32 %v2290_v5, %v154_v10 }
 0x49d   :  { %301 = vrot.lane.b32.xlu1 %v299_v47, %s2228_s18 }
 0x50f   :  { %v302_v50 = vpop.permute.xlu1 %301 }
 0x510   :  { %1895 = vmatmul.mubr.msk.f32.vlgmr.msra.gmra.mrb[2].mxu1 %vm198_vm2, %v302_v50 }
 0x511   :  { %2036 = vmatpush3.bf16.msra.mxu1 %v2306_v21  ;;  %1916 = vmatprep.mubr.msk.f32.mxu1 %vm2225_vm1, %v2226_v20 }
 0x512   :  { %2037 = vmatprep.subr.bf16.mxu1 %v2224_v16 }
 0x515   :  { %2039 = vmatpush3.bf16.msra.mxu1 %v2313_v23 }
 0x516   :  { %2046 = vmatprep.subr.bf16.mxu1 %v2224_v16 }
 0x5e3   :  { %v371_v52 = vpop.f32.mrb[2].mxu1 }
 0x5e4   :  { %v375_v53 = vadd.f32 %v371_v52, %v145_v51  ;;  %v1896_v54 = vpop.f32.mrb[3].mxu1 }
 0x5e5   :  { %v160_v54 = vadd.f32 %v2375_v9, %v2290_v5 }
 0x5e6   :  { %2111 = vtanh.f32 %v375_v53  ;;  %v1760_v56 = vmul.f32 -1.442695, %v375_v53 }
 0x5e8   :  { %2113 = vpow2.f32 %v1760_v56 }
 0x5f0   :  { %v2112_v55 = vpop.eup %2111 }
 0x5f1   :  { %385 = vrot.lane.b32.xlu0 %v2112_v55, %s2223_s1 }
 0x5f2   :  { %v2114_v57 = vpop.eup %2113 }
 0x5f3   :  { %v379_v58 = vadd.f32 1.0, %v2114_v57 }
 0x5f5   :  { %2115 = vrcp.f32 %v379_v58 }
 0x5ff   :  { %v2116_v59 = vpop.eup %2115 }
 0x600   :  { %v383_v62 = vmul.f32 %v2116_v59, %v293_v42 }
 0x663   :  { %v386_v60 = vpop.permute.xlu0 %385 }
 0x664   :  { %v388_v61 = vmul.f32 %v2116_v59, %v386_v60 }
 0x666   :  { %390 = vrot.lane.b32.xlu1 %v388_v61, %s2228_s18 }
 0x6d8   :  { %v391_v63 = vpop.permute.xlu1 %390 }
 0x6d9   :  { %v393_v0 = vadd.f32 %v391_v63, %v383_v62 }
 0x6db   :  { %2117 = vtanh.f32 %v393_v0 }
 0x6e5   :  { %v2118_v6 = vpop.eup %2117 }
 0x6e6   :  { %396 = vrot.lane.b32.xlu0 %v2118_v6, %s2223_s1 }
 0x758   :  { %v397_v7 = vpop.permute.xlu0 %396 }
 0x759   :  { %v399_v8 = vmul.f32 %v2116_v59, %v397_v7  ;;  %v165_v7 = vadd.f32 %v2290_v5, %v2379_v12 }
 0x75b   :  { %401 = vrot.lane.b32.xlu1 %v399_v8, %s2228_s18 }
 0x7cd   :  { %v402_v13 = vpop.permute.xlu1 %401 }
 0x7ce   :  { %1906 = vmatmul.mubr.msk.f32.vlgmr.msra.gmra.mrb[8].mxu0 %vm198_vm2, %v402_v13 }
 0x7cf   :  { %2042 = vmatpush3.bf16.msra.mxu0 %v2306_v21  ;;  %1927 = vmatprep.mubr.msk.f32.mxu0 %vm2225_vm1, %v2226_v20 }
 0x7d0   :  { %2043 = vmatprep.subr.bf16.mxu0 %v2224_v16 }
 0x7d3   :  { %2045 = vmatpush3.bf16.msra.mxu0 %v2313_v23 }
 0x7d4   :  { %2052 = vmatprep.subr.bf16.mxu0 %v2224_v16 }
 0x8a1   :  { %v471_v15 = vpop.f32.mrb[8].mxu0 }
 0x8a2   :  { %v475_v17 = vadd.f32 %v471_v15, %v150_v14  ;;  %v1907_v18 = vpop.f32.mrb[9].mxu0 }
 0x8a4   :  { %2119 = vtanh.f32 %v475_v17  ;;  %v1762_v22 = vmul.f32 -1.442695, %v475_v17 }
 0x8a6   :  { %2121 = vpow2.f32 %v1762_v22 }
 0x8ae   :  { %v2120_v19 = vpop.eup %2119 }
 0x8af   :  { %485 = vrot.lane.b32.xlu0 %v2120_v19, %s2223_s1 }
 0x8b0   :  { %v2122_v24 = vpop.eup %2121 }
 0x8b1   :  { %v479_v25 = vadd.f32 1.0, %v2122_v24 }
 0x8b3   :  { %2123 = vrcp.f32 %v479_v25 }
 0x8bd   :  { %v2124_v26 = vpop.eup %2123 }
 0x8be   :  { %v483_v29 = vmul.f32 %v2124_v26, %v393_v0 }
 0x921   :  { %v486_v27 = vpop.permute.xlu0 %485 }
 0x922   :  { %v488_v28 = vmul.f32 %v2124_v26, %v486_v27 }
 0x924   :  { %490 = vrot.lane.b32.xlu1 %v488_v28, %s2228_s18 }
 0x996   :  { %v491_v30 = vpop.permute.xlu1 %490 }
 0x997   :  { %v493_v31 = vadd.f32 %v491_v30, %v483_v29  ;;  %v170_v30 = vadd.f32 %v2377_v11, %v2290_v5  ;;  %v900_v11 = vld [vmem:[%s2569_s4] sm:$0xff] }
 0x999   :  { %2125 = vtanh.f32 %v493_v31 }
 0x9a3   :  { %v2126_v32 = vpop.eup %2125 }
 0x9a4   :  { %496 = vrot.lane.b32.xlu0 %v2126_v32, %s2223_s1 }
 0xa16   :  { %v497_v33 = vpop.permute.xlu0 %496 }
 0xa17   :  { %v499_v34 = vmul.f32 %v2124_v26, %v497_v33 }
 0xa19   :  { %501 = vrot.lane.b32.xlu1 %v499_v34, %s2228_s18 }
 0xa8b   :  { %v502_v35 = vpop.permute.xlu1 %501 }
 0xa8c   :  { %1917 = vmatmul.mubr.msk.f32.vlgmr.msra.gmra.mrb[4].mxu1 %vm198_vm2, %v502_v35 }
 0xa8d   :  { %2048 = vmatpush3.bf16.msra.mxu1 %v2306_v21  ;;  %1938 = vmatprep.mubr.msk.f32.mxu1 %vm2225_vm1, %v2226_v20 }
 0xa8e   :  { %2049 = vmatprep.subr.bf16.mxu1 %v2224_v16 }
 0xa91   :  { %2051 = vmatpush3.bf16.msra.mxu1 %v2313_v23 }
 0xa92   :  { %2058 = vmatprep.subr.bf16.mxu1 %v2224_v16 }
 0xb5f   :  { %v571_v37 = vpop.f32.mrb[4].mxu1 }
 0xb60   :  { %v575_v38 = vadd.f32 %v571_v37, %v155_v36  ;;  %v1918_v39 = vpop.f32.mrb[5].mxu1 }
 0xb62   :  { %2127 = vtanh.f32 %v575_v38  ;;  %v1764_v41 = vmul.f32 -1.442695, %v575_v38 }
 0xb64   :  { %2129 = vpow2.f32 %v1764_v41 }
 0xb6c   :  { %v2128_v40 = vpop.eup %2127 }
 0xb6d   :  { %585 = vrot.lane.b32.xlu0 %v2128_v40, %s2223_s1 }
 0xb6e   :  { %v2130_v42 = vpop.eup %2129 }
 0xb6f   :  { %v579_v43 = vadd.f32 1.0, %v2130_v42 }
 0xb71   :  { %2131 = vrcp.f32 %v579_v43  ;;  %v901_v43 = vld [vmem:[%s2569_s4 + $0x8] sm:$0xff] }
 0xb7b   :  { %v2132_v44 = vpop.eup %2131 }
 0xb7c   :  { %v583_v47 = vmul.f32 %v2132_v44, %v493_v31 }
 0xbdf   :  { %v586_v45 = vpop.permute.xlu0 %585 }
 0xbe0   :  { %v588_v46 = vmul.f32 %v2132_v44, %v586_v45  ;;  %v2059_v45 = vpack.c.bf16 %v901_v43, %v900_v11 }
 0xbe2   :  { %590 = vrot.lane.b32.xlu1 %v588_v46, %s2228_s18  ;;  %v903_v46 = vld [vmem:[%s2569_s4 + $0x18] sm:$0xff] }
 0xc54   :  { %v591_v48 = vpop.permute.xlu1 %590 }
 0xc55   :  { %v593_v49 = vadd.f32 %v591_v48, %v583_v47 }
 0xc57   :  { %2133 = vtanh.f32 %v593_v49 }
 0xc61   :  { %v2134_v50 = vpop.eup %2133 }
 0xc62   :  { %596 = vrot.lane.b32.xlu0 %v2134_v50, %s2223_s1 }
 0xcd4   :  { %v597_v51 = vpop.permute.xlu0 %596 }
 0xcd5   :  { %v599_v52 = vmul.f32 %v2132_v44, %v597_v51  ;;  %v902_v44 = vld [vmem:[%s2569_s4 + $0x10] sm:$0xff] }
 0xcd6   :  { %v2062_v47 = vpack.c.bf16 %v903_v46, %v902_v44 }
 0xcd7   :  { %601 = vrot.lane.b32.xlu1 %v599_v52, %s2228_s18  ;;  %v1771_v52 = vld [vmem:[%s2570_s6] ss:$0 sm:$0xff] }
 0xd49   :  { %v602_v53 = vpop.permute.xlu1 %601 }
 0xd4a   :  { %1928 = vmatmul.mubr.msk.f32.vlgmr.msra.gmra.mrb[10].mxu0 %vm198_vm2, %v602_v53 }
 0xd4b   :  { %2054 = vmatpush3.bf16.msra.mxu0 %v2306_v21  ;;  %1949 = vmatprep.mubr.msk.f32.mxu0 %vm2225_vm1, %v2226_v20 }
 0xd4c   :  { %2055 = vmatprep.subr.bf16.mxu0 %v2224_v16 }
 0xd4f   :  { %2057 = vmatpush3.bf16.msra.mxu0 %v2313_v23 }
 0xd50   :  { %2064 = vmatprep.subr.bf16.mxu0 %v2224_v16 }
 0xe1d   :  { %v671_v55 = vpop.f32.mrb[10].mxu0 }
 0xe1e   :  { %v675_v56 = vadd.f32 %v671_v55, %v160_v54  ;;  %v1929_v57 = vpop.f32.mrb[11].mxu0 }
 0xe20   :  { %2135 = vtanh.f32 %v675_v56  ;;  %v1766_v21 = vmul.f32 -1.442695, %v675_v56 }
 0xe22   :  { %2137 = vpow2.f32 %v1766_v21 }
 0xe2a   :  { %v2136_v58 = vpop.eup %2135 }
 0xe2b   :  { %685 = vrot.lane.b32.xlu0 %v2136_v58, %s2223_s1 }
 0xe2c   :  { %v2138_v59 = vpop.eup %2137 }
 0xe2d   :  { %v679_v60 = vadd.f32 1.0, %v2138_v59 }
 0xe2f   :  { %2139 = vrcp.f32 %v679_v60 }
 0xe39   :  { %v2140_v61 = vpop.eup %2139 }
 0xe3a   :  { %v683_v63 = vmul.f32 %v2140_v61, %v593_v49 }
 0xe9d   :  { %v686_v62 = vpop.permute.xlu0 %685 }
 0xe9e   :  { %v688_v23 = vmul.f32 %v2140_v61, %v686_v62  ;;  %v986_v62 = vld [vmem:[%s2571_s5] sm:$0xff] }
 0xea0   :  { %690 = vrot.lane.b32.xlu1 %v688_v23, %s2228_s18  ;;  %v987_v23 = vld [vmem:[%s2571_s5 + $0x8] sm:$0xff]  ;;  %s2231_s5 = smov 16  }
 0xf12   :  { %v691_v0 = vpop.permute.xlu1 %690 }
 0xf13   :  { %v693_v1 = vadd.f32 %v691_v0, %v683_v63  ;;  %v2467_v63 = vpack.c.bf16 %v987_v23, %v986_v62 }
 0xf15   :  { %2141 = vtanh.f32 %v693_v1 }
 0xf1f   :  { %v2142_v2 = vpop.eup %2141 }
 0xf20   :  { %696 = vrot.lane.b32.xlu0 %v2142_v2, %s2223_s1 }
 0xf92   :  { %v697_v3 = vpop.permute.xlu0 %696 }
 0xf93   :  { %v699_v4 = vmul.f32 %v2140_v61, %v697_v3 }
 0xf95   :  { %701 = vrot.lane.b32.xlu1 %v699_v4, %s2228_s18 }
0x1007   :  { %v702_v6 = vpop.permute.xlu1 %701 }
0x1008   :  { %1939 = vmatmul.mubr.msk.f32.vlgmr.msra.gmra.mrb[6].mxu1 %vm198_vm2, %v702_v6 }
0x1009   :  { %1960 = vmatprep.mubr.msk.f32.mxu1 %vm2225_vm1, %v2226_v20  ;;  %2060 = vmatpush3.bf16.msra.mxu1 %v2059_v45 }
0x100a   :  { %2061 = vmatprep.subr.bf16.mxu1 %v2224_v16 }
0x100d   :  { %2063 = vmatpush3.bf16.msra.mxu1 %v2062_v47 }
0x100e   :  { %2070 = vmatprep.subr.bf16.mxu1 %v2224_v16 }
0x10db   :  { %v771_v8 = vpop.f32.mrb[6].mxu1 }
0x10dc   :  { %v775_v9 = vadd.f32 %v771_v8, %v165_v7  ;;  %v1940_v10 = vpop.f32.mrb[7].mxu1 }
0x10de   :  { %2143 = vtanh.f32 %v775_v9  ;;  %v1768_v14 = vmul.f32 -1.442695, %v775_v9 }
0x10e0   :  { %2145 = vpow2.f32 %v1768_v14 }
0x10e8   :  { %v2144_v13 = vpop.eup %2143 }
0x10e9   :  { %785 = vrot.lane.b32.xlu0 %v2144_v13, %s2223_s1 }
0x10ea   :  { %v2146_v15 = vpop.eup %2145 }
0x10eb   :  { %v779_v17 = vadd.f32 1.0, %v2146_v15 }
0x10ed   :  { %2147 = vrcp.f32 %v779_v17 }
0x10f7   :  { %v2148_v18 = vpop.eup %2147 }
0x10f8   :  { %v783_v24 = vmul.f32 %v2148_v18, %v693_v1 }
0x115b   :  { %v786_v19 = vpop.permute.xlu0 %785 }
0x115c   :  { %v788_v22 = vmul.f32 %v2148_v18, %v786_v19 }
0x115e   :  { %790 = vrot.lane.b32.xlu1 %v788_v22, %s2228_s18 }
0x11d0   :  { %v791_v25 = vpop.permute.xlu1 %790 }
0x11d1   :  { %v793_v12 = vadd.f32 %v791_v25, %v783_v24 }
0x11d3   :  { %2149 = vtanh.f32 %v793_v12 }
0x11dd   :  { %v2150_v26 = vpop.eup %2149 }
0x11de   :  { %796 = vrot.lane.b32.xlu0 %v2150_v26, %s2223_s1 }
0x1250   :  { %v797_v27 = vpop.permute.xlu0 %796 }
0x1251   :  { %v799_v28 = vmul.f32 %v2148_v18, %v797_v27 }
0x1253   :  { %801 = vrot.lane.b32.xlu1 %v799_v28, %s2228_s18 }
0x12c5   :  { %v802_v29 = vpop.permute.xlu1 %801 }
0x12c6   :  { %1950 = vmatmul.mubr.msk.f32.vlgmr.msra.gmra.mrb[12].mxu0 %vm198_vm2, %v802_v29 }
0x12c7   :  { %1967 = vmatprep.mubr.msk.f32.mxu0 %vm2225_vm1, %v2226_v20  ;;  %2066 = vmatpush3.bf16.msra.mxu0 %v2467_v63 }
0x12c8   :  { %2067 = vmatprep.subr.bf16.mxu0 %v2224_v16 }
0x1399   :  { %v871_v31 = vpop.f32.mrb[12].mxu0 }
0x139a   :  { %v875_v32 = vadd.f32 %v871_v31, %v170_v30  ;;  %v1951_v33 = vpop.f32.mrb[13].mxu0 }
0x139c   :  { %2151 = vtanh.f32 %v875_v32  ;;  %v1770_v35 = vmul.f32 -1.442695, %v875_v32 }
0x139e   :  { %2153 = vpow2.f32 %v1770_v35 }
0x13a6   :  { %v2152_v34 = vpop.eup %2151 }
0x13a7   :  { %885 = vrot.lane.b32.xlu0 %v2152_v34, %s2223_s1 }
0x13a8   :  { %v2154_v36 = vpop.eup %2153 }
0x13a9   :  { %v879_v37 = vadd.f32 1.0, %v2154_v36 }
0x13ab   :  { %2155 = vrcp.f32 %v879_v37 }
0x13b5   :  { %v2156_v38 = vpop.eup %2155 }
0x13b6   :  { %v883_v41 = vmul.f32 %v2156_v38, %v793_v12 }
0x1419   :  { %v886_v39 = vpop.permute.xlu0 %885 }
0x141a   :  { %v888_v40 = vmul.f32 %v2156_v38, %v886_v39 }
0x141c   :  { %890 = vrot.lane.b32.xlu1 %v888_v40, %s2228_s18 }
0x148e   :  { %v891_v42 = vpop.permute.xlu1 %890 }
0x148f   :  { %v893_v5 = vadd.f32 %v891_v42, %v883_v41 }
0x1491   :  { %2157 = vtanh.f32 %v893_v5 }
0x149b   :  { %v2158_v48 = vpop.eup %2157 }
0x149c   :  { %896 = vrot.lane.b32.xlu0 %v2158_v48, %s2223_s1 }
0x150e   :  { %v897_v49 = vpop.permute.xlu0 %896 }
0x150f   :  { %v899_v50 = vmul.f32 %v2156_v38, %v897_v49 }
0x1511   :  { %912 = vrot.lane.b32.xlu1 %v899_v50, %s2228_s18 }
0x1583   :  { %v913_v51 = vpop.permute.xlu1 %912 }
0x1584   :  { %1961 = vmatmul.mubr.msk.f32.vlgmr.msra.gmra.mrb[8].mxu1 %vm198_vm2, %v913_v51 }
0x1585   :  { %1981 = vmatprep.mubr.msk.f32.mxu1 %vm2225_vm1, %v2226_v20  ;;  %2072 = vmatpush3.bf16.msra.mxu1 %v2467_v63 }
0x1586   :  { %2076 = vmatprep.subr.bf16.mxu1 %v2224_v16 }
0x1657   :  { %v982_v53 = vpop.f32.mrb[8].mxu1 }
0x1658   :  { %v2456_v54 = vadd.f32 %v1771_v52, %v982_v53  ;;  %v1962_v55 = vpop.f32.mrb[9].mxu1 }
0x165a   :  { %2159 = vtanh.f32 %v2456_v54  ;;  %v1773_v57 = vmul.f32 -1.442695, %v2456_v54 }
0x165c   :  { %2161 = vpow2.f32 %v1773_v57 }
0x1664   :  { %v2160_v56 = vpop.eup %2159 }
0x1665   :  { %996 = vrot.lane.b32.xlu0 %v2160_v56, %s2227_s2 }
0x1666   :  { %v2162_v58 = vpop.eup %2161 }
0x1667   :  { %v991_v21 = vadd.f32 1.0, %v2162_v58 }
0x1669   :  { %2163 = vrcp.f32 %v991_v21 }
0x1673   :  { %v2164_v59 = vpop.eup %2163 }
0x16d7   :  { %v997_v60 = vpop.permute.xlu0 %996 }
0x16d8   :  { %v999_v61 = vmul.f32 %v2164_v59, %v997_v60 }
0x16da   :  { %2165 = vtanh.f32 %v999_v61 }
0x16e4   :  { %v2166_v0 = vpop.eup %2165 }
0x16e5   :  { %1002 = vrot.lane.b32.xlu1 %v2166_v0, %s2229_s19 }
0x1757   :  { %v1003_v1 = vpop.permute.xlu1 %1002 }
0x1758   :  { %v1005_v2 = vmul.f32 %v2164_v59, %v1003_v1 }
0x175a   :  { %1007 = vrot.lane.b32.xlu0 %v1005_v2, %s2230_s20 }
0x175e   :  { %1090 = vrot.lane.b32.xlu0 %v999_v61, %s2231_s5 }
0x17cc   :  { %v2476_v3 = vpop.permute.xlu0 %1007 }
0x17cd   :  { %1968 = vmatmul.mubr.msk.f32.vlgmr.msra.gmra.mrb[14].mxu0 %vm43_vm0, %v2476_v3 }
0x17ce   :  { %2069 = vmatpush3.bf16.msra.mxu0 %v2467_v63  ;;  %1974 = vmatprep.mubr.msk.f32.mxu0 %vm2225_vm1, %v2226_v20 }
0x17cf   :  { %2073 = vmatprep.subr.bf16.mxu0 %v2224_v16 }
0x17d0   :  { %v1091_v18 = vpop.permute.xlu0 %1090 }
0x18a0   :  { %v1077_v4 = vpop.f32.mrb[14].mxu0 }
0x18a1   :  { %v1081_v6 = vadd.f32 %v1077_v4, %v2456_v54  ;;  %v1969_v7 = vpop.f32.mrb[15].mxu0 }
0x18a3   :  { %2167 = vtanh.f32 %v1081_v6  ;;  %v1775_v9 = vmul.f32 -1.442695, %v1081_v6 }
0x18a5   :  { %2169 = vpow2.f32 %v1775_v9 }
0x18ad   :  { %v2168_v8 = vpop.eup %2167 }
0x18ae   :  { %1095 = vrot.lane.b32.xlu1 %v2168_v8, %s2227_s2 }
0x18af   :  { %v2170_v10 = vpop.eup %2169 }
0x18b0   :  { %v1085_v13 = vadd.f32 1.0, %v2170_v10 }
0x18b2   :  { %2171 = vrcp.f32 %v1085_v13 }
0x18bc   :  { %v2172_v14 = vpop.eup %2171 }
0x18bd   :  { %v1093_v19 = vmul.f32 %v2172_v14, %v1091_v18 }
0x1920   :  { %v1096_v15 = vpop.permute.xlu1 %1095 }
0x1921   :  { %v1098_v17 = vmul.f32 %v2172_v14, %v1096_v15 }
0x1923   :  { %1100 = vrot.lane.b32.xlu1 %v1098_v17, %s2231_s5 }
0x1995   :  { %v1101_v22 = vpop.permute.xlu1 %1100 }
0x1996   :  { %v1103_v24 = vadd.f32 %v1101_v22, %v1093_v19 }
0x1998   :  { %2173 = vtanh.f32 %v1103_v24 }
0x19a2   :  { %v2174_v25 = vpop.eup %2173 }
0x19a3   :  { %1106 = vrot.lane.b32.xlu0 %v2174_v25, %s2228_s18 }
0x1a15   :  { %v1107_v12 = vpop.permute.xlu0 %1106 }
0x1a16   :  { %v2488_v26 = vmul.f32 %v2172_v14, %v1107_v12 }
0x1a18   :  { %1111 = vrot.lane.b32.xlu1 %v2488_v26, %s2230_s20 }
0x1a8a   :  { %v1112_v27 = vpop.permute.xlu1 %1111 }
0x1a8b   :  { %1975 = vmatmul.mubr.msk.f32.vlgmr.msra.gmra.mrb[16].mxu0 %vm43_vm0, %v1112_v27 }
0x1a8c   :  { %2075 = vmatpush3.bf16.msra.mxu0 %v2467_v63  ;;  %1988 = vmatprep.mubr.msk.f32.mxu0 %vm2225_vm1, %v2226_v20 }
0x1a8d   :  { %2079 = vmatprep.subr.bf16.mxu0 %v2224_v16 }
0x1b5e   :  { %v1181_v28 = vpop.f32.mrb[16].mxu0 }
0x1b5f   :  { %v1185_v29 = vadd.f32 %v1181_v28, %v2456_v54  ;;  %v1976_v30 = vpop.f32.mrb[17].mxu0 }
0x1b61   :  { %2175 = vtanh.f32 %v1185_v29  ;;  %v1777_v32 = vmul.f32 -1.442695, %v1185_v29 }
0x1b63   :  { %2177 = vpow2.f32 %v1777_v32 }
0x1b6b   :  { %v2176_v31 = vpop.eup %2175 }
0x1b6c   :  { %1195 = vrot.lane.b32.xlu0 %v2176_v31, %s2227_s2 }
0x1b6d   :  { %v2178_v33 = vpop.eup %2177 }
0x1b6e   :  { %v1189_v34 = vadd.f32 1.0, %v2178_v33 }
0x1b70   :  { %2179 = vrcp.f32 %v1189_v34 }
0x1b7a   :  { %v2180_v35 = vpop.eup %2179 }
0x1b7b   :  { %v1193_v38 = vmul.f32 %v2180_v35, %v1103_v24 }
0x1bde   :  { %v1196_v36 = vpop.permute.xlu0 %1195 }
0x1bdf   :  { %v1198_v37 = vmul.f32 %v2180_v35, %v1196_v36 }
0x1be1   :  { %1200 = vrot.lane.b32.xlu1 %v1198_v37, %s2231_s5 }
0x1c53   :  { %v1201_v39 = vpop.permute.xlu1 %1200 }
0x1c54   :  { %v1203_v40 = vadd.f32 %v1201_v39, %v1193_v38 }
0x1c56   :  { %2181 = vtanh.f32 %v1203_v40 }
0x1c60   :  { %v2182_v41 = vpop.eup %2181 }
0x1c61   :  { %1206 = vrot.lane.b32.xlu0 %v2182_v41, %s2228_s18 }
0x1cd3   :  { %v1207_v42 = vpop.permute.xlu0 %1206 }
0x1cd4   :  { %v2501_v5 = vmul.f32 %v2180_v35, %v1207_v42 }
0x1cd6   :  { %1211 = vrot.lane.b32.xlu1 %v2501_v5, %s2230_s20 }
0x1d48   :  { %v1212_v11 = vpop.permute.xlu1 %1211 }
0x1d49   :  { %1982 = vmatmul.mubr.msk.f32.vlgmr.msra.gmra.mrb[10].mxu1 %vm43_vm0, %v1212_v11 }
0x1d4a   :  { %2078 = vmatpush3.bf16.msra.mxu1 %v2467_v63  ;;  %1995 = vmatprep.mubr.msk.f32.mxu1 %vm2225_vm1, %v2226_v20 }
0x1d4b   :  { %2082 = vmatprep.subr.bf16.mxu1 %v2224_v16 }
0x1e1c   :  { %v1281_v43 = vpop.f32.mrb[10].mxu1 }
0x1e1d   :  { %v1285_v44 = vadd.f32 %v1281_v43, %v2456_v54  ;;  %v1983_v45 = vpop.f32.mrb[11].mxu1 }
0x1e1f   :  { %2183 = vtanh.f32 %v1285_v44  ;;  %v1779_v47 = vmul.f32 -1.442695, %v1285_v44 }
0x1e21   :  { %2185 = vpow2.f32 %v1779_v47 }
0x1e29   :  { %v2184_v46 = vpop.eup %2183 }
0x1e2a   :  { %1295 = vrot.lane.b32.xlu0 %v2184_v46, %s2227_s2 }
0x1e2b   :  { %v2186_v48 = vpop.eup %2185 }
0x1e2c   :  { %v1289_v49 = vadd.f32 1.0, %v2186_v48 }
0x1e2e   :  { %2187 = vrcp.f32 %v1289_v49 }
0x1e38   :  { %v2188_v50 = vpop.eup %2187 }
0x1e39   :  { %v1293_v53 = vmul.f32 %v2188_v50, %v1203_v40 }
0x1e9c   :  { %v1296_v51 = vpop.permute.xlu0 %1295 }
0x1e9d   :  { %v1298_v52 = vmul.f32 %v2188_v50, %v1296_v51 }
0x1e9f   :  { %1300 = vrot.lane.b32.xlu1 %v1298_v52, %s2231_s5 }
0x1f11   :  { %v1301_v16 = vpop.permute.xlu1 %1300 }
0x1f12   :  { %v1303_v55 = vadd.f32 %v1301_v16, %v1293_v53 }
0x1f14   :  { %2189 = vtanh.f32 %v1303_v55 }
0x1f1e   :  { %v2190_v56 = vpop.eup %2189 }
0x1f1f   :  { %1306 = vrot.lane.b32.xlu0 %v2190_v56, %s2228_s18 }
0x1f91   :  { %v1307_v57 = vpop.permute.xlu0 %1306 }
0x1f92   :  { %v2514_v58 = vmul.f32 %v2188_v50, %v1307_v57 }
0x1f94   :  { %1311 = vrot.lane.b32.xlu1 %v2514_v58, %s2230_s20 }
0x2006   :  { %v1312_v21 = vpop.permute.xlu1 %1311 }
0x2007   :  { %1989 = vmatmul.mubr.msk.f32.vlgmr.msra.gmra.mrb[18].mxu0 %vm43_vm0, %v1312_v21 }
0x2008   :  { %2081 = vmatpush3.bf16.msra.mxu0 %v2467_v63  ;;  %2002 = vmatprep.mubr.msk.f32.mxu0 %vm2225_vm1, %v2226_v20 }
0x20da   :  { %v1381_v59 = vpop.f32.mrb[18].mxu0 }
0x20db   :  { %v1385_v60 = vadd.f32 %v1381_v59, %v2456_v54  ;;  %v1990_v61 = vpop.f32.mrb[19].mxu0 }
0x20dd   :  { %2191 = vtanh.f32 %v1385_v60  ;;  %v1781_v23 = vmul.f32 -1.442695, %v1385_v60 }
0x20df   :  { %2193 = vpow2.f32 %v1781_v23 }
0x20e7   :  { %v2192_v62 = vpop.eup %2191 }
0x20e8   :  { %1395 = vrot.lane.b32.xlu0 %v2192_v62, %s2227_s2 }
0x20e9   :  { %v2194_v0 = vpop.eup %2193 }
0x20ea   :  { %v1389_v1 = vadd.f32 1.0, %v2194_v0 }
0x20ec   :  { %2195 = vrcp.f32 %v1389_v1 }
0x20f6   :  { %v2196_v2 = vpop.eup %2195 }
0x20f7   :  { %v1393_v7 = vmul.f32 %v2196_v2, %v1303_v55 }
0x215a   :  { %v1396_v4 = vpop.permute.xlu0 %1395 }
0x215b   :  { %v1398_v6 = vmul.f32 %v2196_v2, %v1396_v4 }
0x215d   :  { %1400 = vrot.lane.b32.xlu1 %v1398_v6, %s2231_s5 }
0x21cf   :  { %v1401_v8 = vpop.permute.xlu1 %1400 }
0x21d0   :  { %v1403_v9 = vadd.f32 %v1401_v8, %v1393_v7 }
0x21d2   :  { %2197 = vtanh.f32 %v1403_v9 }
0x21dc   :  { %v2198_v10 = vpop.eup %2197 }
0x21dd   :  { %1406 = vrot.lane.b32.xlu0 %v2198_v10, %s2228_s18 }
0x224f   :  { %v1407_v13 = vpop.permute.xlu0 %1406 }
0x2250   :  { %v2526_v14 = vmul.f32 %v2196_v2, %v1407_v13 }
0x2252   :  { %1411 = vrot.lane.b32.xlu1 %v2526_v14, %s2230_s20 }
0x22c4   :  { %v1412_v15 = vpop.permute.xlu1 %1411 }
0x22c5   :  { %1996 = vmatmul.mubr.msk.f32.vlgmr.msra.gmra.mrb[12].mxu1 %vm43_vm0, %v1412_v15 }
0x22c6   :  { %2084 = vmatpush3.bf16.msra.mxu1 %v2467_v63  ;;  %2009 = vmatprep.mubr.msk.f32.mxu1 %vm2225_vm1, %v2226_v20 }
0x2398   :  { %v1481_v17 = vpop.f32.mrb[12].mxu1 }
0x2399   :  { %v1485_v18 = vadd.f32 %v1481_v17, %v2456_v54  ;;  %v1997_v19 = vpop.f32.mrb[13].mxu1 }
0x239b   :  { %2199 = vtanh.f32 %v1485_v18  ;;  %v1783_v24 = vmul.f32 -1.442695, %v1485_v18 }
0x239d   :  { %2201 = vpow2.f32 %v1783_v24 }
0x23a5   :  { %v2200_v22 = vpop.eup %2199 }
0x23a6   :  { %1495 = vrot.lane.b32.xlu0 %v2200_v22, %s2227_s2 }
0x23a7   :  { %v2202_v25 = vpop.eup %2201 }
0x23a8   :  { %v1489_v12 = vadd.f32 1.0, %v2202_v25 }
0x23aa   :  { %2203 = vrcp.f32 %v1489_v12 }
0x23b4   :  { %v2204_v27 = vpop.eup %2203 }
0x23b5   :  { %v1493_v63 = vmul.f32 %v2204_v27, %v1403_v9 }
0x2418   :  { %v1496_v28 = vpop.permute.xlu0 %1495 }
0x2419   :  { %v1498_v29 = vmul.f32 %v2204_v27, %v1496_v28 }
0x241b   :  { %1500 = vrot.lane.b32.xlu1 %v1498_v29, %s2231_s5 }
0x248d   :  { %v1501_v20 = vpop.permute.xlu1 %1500 }
0x248e   :  { %v1503_v30 = vadd.f32 %v1501_v20, %v1493_v63 }
0x2490   :  { %2205 = vtanh.f32 %v1503_v30 }
0x249a   :  { %v2206_v31 = vpop.eup %2205 }
0x249b   :  { %1506 = vrot.lane.b32.xlu0 %v2206_v31, %s2228_s18 }
0x250d   :  { %v1507_v32 = vpop.permute.xlu0 %1506 }
0x250e   :  { %v1509_v33 = vmul.f32 %v2204_v27, %v1507_v32 }
0x2510   :  { %1511 = vrot.lane.b32.xlu1 %v1509_v33, %s2230_s20 }
0x2582   :  { %v1512_v34 = vpop.permute.xlu1 %1511 }
0x2583   :  { %2003 = vmatmul.mubr.msk.f32.vlgmr.msra.gmra.mrb[20].mxu0 %vm43_vm0, %v1512_v34 }
0x2656   :  { %v1581_v35 = vpop.f32.mrb[20].mxu0 }
0x2657   :  { %v1585_v36 = vadd.f32 %v1581_v35, %v2456_v54  ;;  %v2004_v37 = vpop.f32.mrb[21].mxu0 }
0x2659   :  { %2207 = vtanh.f32 %v1585_v36  ;;  %v1785_v39 = vmul.f32 -1.442695, %v1585_v36 }
0x265b   :  { %2209 = vpow2.f32 %v1785_v39 }
0x2663   :  { %v2208_v38 = vpop.eup %2207 }
0x2664   :  { %1595 = vrot.lane.b32.xlu0 %v2208_v38, %s2227_s2 }
0x2665   :  { %v2210_v40 = vpop.eup %2209 }
0x2666   :  { %v1589_v41 = vadd.f32 1.0, %v2210_v40 }
0x2668   :  { %2211 = vrcp.f32 %v1589_v41 }
0x2672   :  { %v2212_v42 = vpop.eup %2211 }
0x2673   :  { %v1593_v44 = vmul.f32 %v2212_v42, %v1503_v30 }
0x26d6   :  { %v1596_v11 = vpop.permute.xlu0 %1595 }
0x26d7   :  { %v1598_v43 = vmul.f32 %v2212_v42, %v1596_v11 }
0x26d9   :  { %1600 = vrot.lane.b32.xlu1 %v1598_v43, %s2231_s5 }
0x274b   :  { %v1601_v45 = vpop.permute.xlu1 %1600 }
0x274c   :  { %v1603_v46 = vadd.f32 %v1601_v45, %v1593_v44 }
0x274e   :  { %2213 = vtanh.f32 %v1603_v46 }
0x2758   :  { %v2214_v47 = vpop.eup %2213 }
0x2759   :  { %1606 = vrot.lane.b32.xlu0 %v2214_v47, %s2228_s18 }
0x27cb   :  { %v1607_v48 = vpop.permute.xlu0 %1606 }
0x27cc   :  { %v1609_v49 = vmul.f32 %v2212_v42, %v1607_v48 }
0x27ce   :  { %1611 = vrot.lane.b32.xlu1 %v1609_v49, %s2230_s20 }
0x2840   :  { %v1612_v50 = vpop.permute.xlu1 %1611 }
0x2841   :  { %2010 = vmatmul.mubr.msk.f32.vlgmr.msra.gmra.mrb[14].mxu1 %vm43_vm0, %v1612_v50 }
0x2914   :  { %v1681_v51 = vpop.f32.mrb[14].mxu1 }
0x2915   :  { %v1685_v52 = vadd.f32 %v1681_v51, %v2456_v54  ;;  %v2011_v53 = vpop.f32.mrb[15].mxu1 }
0x2917   :  { %2215 = vtanh.f32 %v1685_v52  ;;  %v1787_v55 = vmul.f32 -1.442695, %v1685_v52 }
0x2919   :  { %2217 = vpow2.f32 %v1787_v55 }
0x2921   :  { %v2216_v16 = vpop.eup %2215 }
0x2922   :  { %1695 = vrot.lane.b32.xlu0 %v2216_v16, %s2227_s2 }
0x2923   :  { %v2218_v56 = vpop.eup %2217 }
0x2924   :  { %v1689_v57 = vadd.f32 1.0, %v2218_v56 }
0x2926   :  { %2219 = vrcp.f32 %v1689_v57 }
0x2930   :  { %v2220_v21 = vpop.eup %2219 }
0x2931   :  { %v1693_v54 = vmul.f32 %v2220_v21, %v1603_v46 }
0x2994   :  { %v1696_v59 = vpop.permute.xlu0 %1695 }
0x2995   :  { %v1698_v60 = vmul.f32 %v2220_v21, %v1696_v59 }
0x2997   :  { %1700 = vrot.lane.b32.xlu1 %v1698_v60, %s2231_s5 }
0x299b   :  { %1711 = vrot.lane.b32.xlu1 %v2488_v26, %s2227_s2 }
0x299f   :  { %1717 = vrot.lane.b32.xlu1 %v2526_v14, %s2231_s5 }
0x29a3   :  { %1723 = vrot.lane.b32.xlu1 %v1609_v49, %s2229_s19 }
0x2a09   :  { %v1701_v61 = vpop.permute.xlu1 %1700 }
0x2a0a   :  { %v1703_v62 = vadd.f32 %v1701_v61, %v1693_v54 }
0x2a0c   :  { %2221 = vtanh.f32 %v1703_v62 }
0x2a0d   :  { %v1712_v26 = vpop.permute.xlu1 %1711 }
0x2a0e   :  { %v1730_v4 = vsel %vm43_vm0, %v2476_v3, %v1712_v26 }
0x2a11   :  { %v1718_v8 = vpop.permute.xlu1 %1717 }
0x2a15   :  { %v1724_v13 = vpop.permute.xlu1 %1723 }
0x2a16   :  { %v2222_v23 = vpop.eup %2221 }
0x2a17   :  { %1706 = vrot.lane.b32.xlu0 %v2222_v23, %s2228_s18 }
0x2a1b   :  { %1714 = vrot.lane.b32.xlu0 %v2501_v5, %s2232_s21 }
0x2a1f   :  { %1720 = vrot.lane.b32.xlu0 %v1509_v33, %s2228_s18 }
0x2a89   :  { %v1707_v0 = vpop.permute.xlu0 %1706 }
0x2a8a   :  { %v1709_v1 = vmul.f32 %v2220_v21, %v1707_v0 }
0x2a8c   :  { %1727 = vrot.lane.b32.xlu0 %v1709_v1, %s2223_s1 }
0x2a8d   :  { %v1715_v2 = vpop.permute.xlu0 %1714 }
0x2a8e   :  { %v1731_v6 = vsel %vm198_vm2, %v1730_v4, %v1715_v2 }
0x2a8f   :  { %v1733_v7 = vsel %vm1732_vm3, %v1731_v6, %v2514_v58 }
0x2a90   :  { %v1735_v9 = vsel %vm1734_vm4, %v1733_v7, %v1718_v8 }
0x2a91   :  { %v1721_v5 = vpop.permute.xlu0 %1720 }
0x2a92   :  { %v1737_v10 = vsel %vm1736_vm5, %v1735_v9, %v1721_v5 }
0x2a93   :  { %v1739_v14 = vsel %vm1738_vm6, %v1737_v10, %v1724_v13 }
0x2afe   :  { %v1728_v15 = vpop.permute.xlu0 %1727 }
0x2aff   :  { %v1741_v17 = vsel %vm1740_vm7, %v1739_v14, %v1728_v15 }
0x2b00   :  { %1742 = vst [vmem:[%s2572_s7] sm:$0xff] %v1741_v17 }

</bundles_post_ra>
